<compile_context>
chip_gen: v7x
topology: tpu7x:2x2x1
jax: 0.10.0
libtpu: 0.0.40
codegen_flags: <defaults>
</compile_context>

<pallas_src>
import jax
import jax.numpy as jnp
from jax.experimental import pallas as pl
from jax.experimental.pallas import tpu as pltpu

LANE = 128      # vreg lane width
SUBLANE = 8     # f32 sublane count
MIB = 1024 * 1024


# ---------------------------------------------------------------------------
# Small helpers
# ---------------------------------------------------------------------------
def _round_up(x, m):
    return ((x + m - 1) // m) * m


def _cdiv(a, b):
    return -(-a // b)


def _pad2d(a, rows, cols):
    pr, pc = rows - a.shape[0], cols - a.shape[1]
    if pr == 0 and pc == 0:
        return a
    return jnp.pad(a, ((0, pr), (0, pc)))


def _hw_policy():
    """(tensorcores per chip, VMEM-limit cap in bytes) by TPU generation."""
    try:
        kind = jax.devices()[0].device_kind.lower()
    except Exception:
        kind = ""
    if "v7" in kind:
        return 2, 48 * MIB      # v7x: 2 TCs, 64 MiB physical VMEM -> leave headroom
    # v5e / v6e (and anything else): single TC, 128 MiB physical VMEM
    return 1, 64 * MIB


def _vmem_estimate(batch_tile, pdims, x_itemsize, mxu_itemsize):
    """Conservative working-set estimate for one grid step."""
    max_d = max(pdims)
    x_bytes = 2 * batch_tile * pdims[0] * x_itemsize            # double-buffered x tile
    o_bytes = 2 * batch_tile * pdims[-1] * 4                    # double-buffered out tile
    wb_bytes = sum(
        2 * (pdims[i] * pdims[i + 1] * mxu_itemsize + pdims[i + 1] * 4)
        for i in range(len(pdims) - 1))                         # params (conservatively x2)
    # live activations inside a step: h (f32) + MXU-dtype cast of h + f32 accumulator
    act_bytes = batch_tile * max_d * (4 + mxu_itemsize + 4)
    return x_bytes + o_bytes + wb_bytes + act_bytes


def _batch_tiling(batch, pdims, x_itemsize, mxu_itemsize, num_tc, vmem_budget):
    """Pick (batch_tile, num_grid_steps, padded_batch), generation aware."""
    padded = _round_up(batch, SUBLANE)
    # Tile cap: 512-1024 rows when feature dims are small (review item); shrink until
    # the estimated working set fits the VMEM budget.
    cap = 1024 if max(pdims) <= 512 else 512
    while cap > SUBLANE and _vmem_estimate(cap, pdims, x_itemsize, mxu_itemsize) > vmem_budget:
        cap = max(SUBLANE, cap // 2)

    if num_tc >= 2 and padded >= 2 * SUBLANE:
        # v7x: even number of tiles so both TensorCores get balanced work.
        n = 2
        while _round_up(_cdiv(padded, n), SUBLANE) > cap:
            n += 2
        tile = _round_up(_cdiv(padded, n), SUBLANE)
    else:
        # v5e / v6e: single TC -> as few grid steps as possible (no forced split).
        tile = min(cap, padded)
        n = _cdiv(padded, tile)
    return tile, n, n * tile


# ---------------------------------------------------------------------------
# One-time parameter prep (hoisted out of the per-call forward)
# ---------------------------------------------------------------------------
def prepare_ewc_params(weights, biases, *, mxu_dtype=jnp.bfloat16):
    """Lane-pad every layer width to a multiple of 128 and cast weights to the MXU
    feed dtype. Zero padding is exact for this MLP (padded rows/cols/lanes stay 0
    through bias-add and ReLU). Call once; reuse across forward calls.

    weights[i]: (in_dim_i, out_dim_i)   (transposed vs nn.Linear)
    biases[i]:  (1, out_dim_i) or (out_dim_i,)
    """
    in_dim = weights[0].shape[0]
    dims = [in_dim] + [w.shape[1] for w in weights]
    pdims = tuple(_round_up(d, LANE) for d in dims)
    w_p = tuple(_pad2d(w, pdims[i], pdims[i + 1]).astype(mxu_dtype)
                for i, w in enumerate(weights))
    b_p = tuple(_pad2d(jnp.asarray(b).reshape(1, -1), 1, pdims[i + 1]).astype(jnp.float32)
                for i, b in enumerate(biases))
    return {"weights": w_p, "biases": b_p, "pdims": pdims,
            "in_dim": dims[0], "out_dim": dims[-1],
            "mxu_dtype": jnp.dtype(mxu_dtype)}


# ---------------------------------------------------------------------------
# Fused MLP kernel
# ---------------------------------------------------------------------------
def _make_mlp_kernel(num_linear, mxu_dtype):
    """relu(x@W0+b0) ... @ W_last + b_last (no ReLU on last layer).
    MXU operands are `mxu_dtype`; accumulation and elementwise (bias/ReLU) are f32."""

    def kernel(x_ref, *refs):
        # refs = (w0, b0, w1, b1, ..., w_{L-1}, b_{L-1}, out_ref)
        out_ref = refs[-1]
        h = x_ref[...]                                   # f32 input tile
        for i in range(num_linear):
            w = refs[2 * i][...]                         # stored in mxu_dtype
            b = refs[2 * i + 1][...]                     # f32, (1, out_dim) lane-dense
            acc = jnp.dot(h.astype(mxu_dtype), w,
                          preferred_element_type=jnp.float32)
            h = acc + b                                  # f32 elementwise (VPU)
            if i < num_linear - 1:
                h = jnp.maximum(h, 0.0)                  # ReLU on hidden layers only
        out_ref[...] = h.astype(out_ref.dtype)

    return kernel


# ---------------------------------------------------------------------------
# Forward wrapper
# ---------------------------------------------------------------------------
def ewc_forward(x, prep, *, batch_tile=None, out_dtype=jnp.float32):
    """Forward pass of EWC (multihead=False): x.view(batch,-1) -> fused MLP.

    `prep` comes from prepare_ewc_params (padded + MXU-dtype parameters).
    Output is f32 by default (keeps log_softmax downstream in full precision).
    """
    w_p, b_p = prep["weights"], prep["biases"]
    pdims, in_dim, out_dim = prep["pdims"], prep["in_dim"], prep["out_dim"]
    mxu_dtype = prep["mxu_dtype"]
    num_linear = len(w_p)

    batch = x.shape[0]
    x2d = x.reshape(batch, -1)
    assert x2d.shape[1] == in_dim, (x2d.shape, in_dim)

    num_tc, vmem_cap = _hw_policy()
    x_itemsize = jnp.dtype(x2d.dtype).itemsize
    mxu_itemsize = mxu_dtype.itemsize
    vmem_budget = vmem_cap - 8 * MIB     # Python-side budget, headroom under compiler limit

    if batch_tile is None:
        tile, n_steps, pbatch = _batch_tiling(
            batch, pdims, x_itemsize, mxu_itemsize, num_tc, vmem_budget)
    else:
        tile = max(SUBLANE, _round_up(batch_tile, SUBLANE))
        n_steps = _cdiv(_round_up(batch, SUBLANE), tile)
        pbatch = n_steps * tile

    # Pad x only when actually required (no-op for lane/tile-aligned inputs); no dtype
    # repack -- the only cast to the MXU feed dtype is in-register inside the kernel.
    x_p = _pad2d(x2d, pbatch, pdims[0])

    kernel = _make_mlp_kernel(num_linear, mxu_dtype)

    # x / out tiled over the batch; weights & biases use constant-index full-array
    # blocks -- Pallas skips the re-DMA when the block index is unchanged between
    # grid steps, so the (small) params stay VMEM-resident for the whole grid.
    in_specs = [pl.BlockSpec((tile, pdims[0]), lambda i: (i, 0))]
    for w, b in zip(w_p, b_p):
        in_specs.append(pl.BlockSpec(w.shape, lambda i: (0, 0)))
        in_specs.append(pl.BlockSpec(b.shape, lambda i: (0, 0)))
    out_spec = pl.BlockSpec((tile, pdims[-1]), lambda i: (i, 0))

    est = _vmem_estimate(tile, pdims, x_itemsize, mxu_itemsize)
    vmem_limit = int(min(vmem_cap, max(32 * MIB, est + 8 * MIB)))

    fn = pl.pallas_call(
        kernel,
        out_shape=jax.ShapeDtypeStruct((pbatch, pdims[-1]), out_dtype),
        grid_spec=pltpu.PrefetchScalarGridSpec(
            num_scalar_prefetch=0,
            grid=(n_steps,),
            in_specs=in_specs,
            out_specs=out_spec,
        ),
        compiler_params=pltpu.CompilerParams(
            dimension_semantics=("parallel",),
            vmem_limit_bytes=vmem_limit),
    )
    params_flat = [a for wb in zip(w_p, b_p) for a in wb]
    out_padded = fn(x_p, *params_flat)
    return out_padded[:batch, :out_dim]


# ---------------------------------------------------------------------------
# Reference + init
# ---------------------------------------------------------------------------
def init_mlp_params(key, input_dim, hidden_dims, output_dim):
    """Deterministic init mimicking nn.Linear (uniform +-1/sqrt(fan_in))."""
    dims = [input_dim] + list(hidden_dims) + [output_dim]
    weights, biases = [], []
    for i in range(len(dims) - 1):
        key, kw, kb = jax.random.split(key, 3)
        bound = 1.0 / jnp.sqrt(float(dims[i]))
        w = jax.random.uniform(kw, (dims[i], dims[i + 1]), jnp.float32,
                               minval=-bound, maxval=bound)
        b = jax.random.uniform(kb, (1, dims[i + 1]), jnp.float32,
                               minval=-bound, maxval=bound)
        weights.append(w)
        biases.append(b)
    return weights, biases


def ewc_forward_ref(x, weights, biases, *, mxu_dtype=jnp.float32):
    """Pure-JAX reference. mxu_dtype=bf16 emulates the kernel's bf16 MXU feed
    (f32 accumulation) for a tight correctness check."""
    h = x.reshape(x.shape[0], -1).astype(jnp.float32)
    for i, (w, b) in enumerate(zip(weights, biases)):
        h = jnp.dot(h.astype(mxu_dtype), w.astype(mxu_dtype),
                    preferred_element_type=jnp.float32) + b
        if i < len(weights) - 1:
            h = jnp.maximum(h, 0.0)
    return h


# ---------------------------------------------------------------------------
# Demo / self-check
# ---------------------------------------------------------------------------
if __name__ == "__main__":
    # Small shapes consistent with the module's forward:
    # x (batch, C, H, W) -> flattened to (batch, input_dim=128).
    batch = 128
    input_dim = 128          # 1 * 8 * 16
    hidden_dims = [64, 32]
    output_dim = 10

    key = jax.random.PRNGKey(0)
    key, kx = jax.random.split(key)
    x = jax.random.normal(kx, (batch, 1, 8, 16), jnp.float32)
    weights, biases = init_mlp_params(key, input_dim, hidden_dims, output_dim)

    # One-time parameter prep (pad + cast), hoisted out of the per-call forward.
    prep_bf16 = prepare_ewc_params(weights, biases, mxu_dtype=jnp.bfloat16)
    prep_f32 = prepare_ewc_params(weights, biases, mxu_dtype=jnp.float32)

    # bf16 MXU feed (default, fast path).
    out = jax.block_until_ready(ewc_forward(x, prep_bf16))
    assert out.shape == (batch, output_dim)

    ref_bf16 = ewc_forward_ref(x, weights, biases, mxu_dtype=jnp.bfloat16)
    ref_f32 = ewc_forward_ref(x, weights, biases)
    assert jnp.allclose(out, ref_bf16, atol=1e-2, rtol=1e-2), "mismatch vs bf16 reference"
    assert jnp.allclose(out, ref_f32, atol=5e-2, rtol=5e-2), "mismatch vs f32 reference"

    # Optional f32 MXU path (closer parity with the f32 PyTorch forward).
    out_f32 = jax.block_until_ready(ewc_forward(x, prep_f32))
    assert out_f32.shape == (batch, output_dim)
    assert jnp.allclose(out_f32, ref_f32, atol=2e-2, rtol=2e-2), "mismatch (f32 path)"

    print("KERNEL_OK")
</pallas_src>

<mosaic_0001>
module attributes {stable_mosaic.version = 11 : i64} {
  func.func @kernel(%arg0: i32, %arg1: memref<128x128xf32, #tpu.memory_space<vmem>>, %arg2: memref<128x128xbf16, #tpu.memory_space<vmem>>, %arg3: memref<1x128xf32, #tpu.memory_space<vmem>>, %arg4: memref<128x128xbf16, #tpu.memory_space<vmem>>, %arg5: memref<1x128xf32, #tpu.memory_space<vmem>>, %arg6: memref<128x128xbf16, #tpu.memory_space<vmem>>, %arg7: memref<1x128xf32, #tpu.memory_space<vmem>>, %arg8: memref<128x128xf32, #tpu.memory_space<vmem>>) attributes {dimension_semantics = [#tpu.dimension_semantics<parallel>], iteration_bounds = array<i64: 1>, scalar_prefetch = 0 : i64, scratch_operands = 0 : i64, tpu.core_type = #tpu.core_type<tc>, window_params = [{transform_indices = @transform_0, window_bounds = array<i64: 128, 128>}, {pipeline_mode = #tpu.pipeline_mode<synchronous>, transform_indices = @transform_1, window_bounds = array<i64: 128, 128>}, {pipeline_mode = #tpu.pipeline_mode<synchronous>, transform_indices = @transform_2, window_bounds = array<i64: 1, 128>}, {pipeline_mode = #tpu.pipeline_mode<synchronous>, transform_indices = @transform_3, window_bounds = array<i64: 128, 128>}, {pipeline_mode = #tpu.pipeline_mode<synchronous>, transform_indices = @transform_4, window_bounds = array<i64: 1, 128>}, {pipeline_mode = #tpu.pipeline_mode<synchronous>, transform_indices = @transform_5, window_bounds = array<i64: 128, 128>}, {pipeline_mode = #tpu.pipeline_mode<synchronous>, transform_indices = @transform_6, window_bounds = array<i64: 1, 128>}, {transform_indices = @transform_7, window_bounds = array<i64: 128, 128>}]} {
    %c0 = arith.constant 0 : index
    %c0_0 = arith.constant 0 : index
    %0 = vector.load %arg1[%c0, %c0_0] : memref<128x128xf32, #tpu.memory_space<vmem>>, vector<128x128xf32>
    %c0_1 = arith.constant 0 : index
    %c0_2 = arith.constant 0 : index
    %1 = vector.load %arg2[%c0_1, %c0_2] : memref<128x128xbf16, #tpu.memory_space<vmem>>, vector<128x128xbf16>
    %c0_3 = arith.constant 0 : index
    %c0_4 = arith.constant 0 : index
    %2 = vector.load %arg3[%c0_3, %c0_4] : memref<1x128xf32, #tpu.memory_space<vmem>>, vector<1x128xf32>
    %3 = arith.truncf %0 : vector<128x128xf32> to vector<128x128xbf16>
    %cst = arith.constant dense<0.000000e+00> : vector<128x128xf32>
    %4 = tpu.matmul %3, %1, %cst {dimension_numbers = #tpu.dot_dimension_numbers<[1], [0], [0], [1], [0, 0, 1, 1], [], []>} : vector<128x128xbf16>, vector<128x128xbf16>, vector<128x128xf32> -> vector<128x128xf32>
    %5 = vector.broadcast %2 : vector<1x128xf32> to vector<128x128xf32>
    %6 = arith.addf %4, %5 : vector<128x128xf32>
    %cst_5 = arith.constant 0.000000e+00 : f32
    %7 = vector.broadcast %cst_5 : f32 to vector<128x128xf32>
    %8 = arith.maximumf %6, %7 : vector<128x128xf32>
    %c0_6 = arith.constant 0 : index
    %c0_7 = arith.constant 0 : index
    %9 = vector.load %arg4[%c0_6, %c0_7] : memref<128x128xbf16, #tpu.memory_space<vmem>>, vector<128x128xbf16>
    %c0_8 = arith.constant 0 : index
    %c0_9 = arith.constant 0 : index
    %10 = vector.load %arg5[%c0_8, %c0_9] : memref<1x128xf32, #tpu.memory_space<vmem>>, vector<1x128xf32>
    %11 = arith.truncf %8 : vector<128x128xf32> to vector<128x128xbf16>
    %cst_10 = arith.constant dense<0.000000e+00> : vector<128x128xf32>
    %12 = tpu.matmul %11, %9, %cst_10 {dimension_numbers = #tpu.dot_dimension_numbers<[1], [0], [0], [1], [0, 0, 1, 1], [], []>} : vector<128x128xbf16>, vector<128x128xbf16>, vector<128x128xf32> -> vector<128x128xf32>
    %13 = vector.broadcast %10 : vector<1x128xf32> to vector<128x128xf32>
    %14 = arith.addf %12, %13 : vector<128x128xf32>
    %cst_11 = arith.constant 0.000000e+00 : f32
    %15 = vector.broadcast %cst_11 : f32 to vector<128x128xf32>
    %16 = arith.maximumf %14, %15 : vector<128x128xf32>
    %c0_12 = arith.constant 0 : index
    %c0_13 = arith.constant 0 : index
    %17 = vector.load %arg6[%c0_12, %c0_13] : memref<128x128xbf16, #tpu.memory_space<vmem>>, vector<128x128xbf16>
    %c0_14 = arith.constant 0 : index
    %c0_15 = arith.constant 0 : index
    %18 = vector.load %arg7[%c0_14, %c0_15] : memref<1x128xf32, #tpu.memory_space<vmem>>, vector<1x128xf32>
    %19 = arith.truncf %16 : vector<128x128xf32> to vector<128x128xbf16>
    %cst_16 = arith.constant dense<0.000000e+00> : vector<128x128xf32>
    %20 = tpu.matmul %19, %17, %cst_16 {dimension_numbers = #tpu.dot_dimension_numbers<[1], [0], [0], [1], [0, 0, 1, 1], [], []>} : vector<128x128xbf16>, vector<128x128xbf16>, vector<128x128xf32> -> vector<128x128xf32>
    %21 = vector.broadcast %18 : vector<1x128xf32> to vector<128x128xf32>
    %22 = arith.addf %20, %21 : vector<128x128xf32>
    %c0_17 = arith.constant 0 : index
    %c0_18 = arith.constant 0 : index
    %23 = vector.load %arg8[%c0_17, %c0_18] : memref<128x128xf32, #tpu.memory_space<vmem>>, vector<128x128xf32>
    tpu.vector_store %arg8[%c0_17, %c0_18], %22 {strides = array<i32>} : memref<128x128xf32, #tpu.memory_space<vmem>>, vector<128x128xf32>,
    return
  }
  func.func @transform_0(%arg0: i32) -> (i32, i32) {
    %c0_i32 = arith.constant 0 : i32
    %c0_i32_0 = arith.constant 0 : i32
    return %arg0, %c0_i32 : i32, i32
  }
  func.func @transform_1(%arg0: i32) -> (i32, i32) {
    %c0_i32 = arith.constant 0 : i32
    %c0_i32_0 = arith.constant 0 : i32
    %c0_i32_1 = arith.constant 0 : i32
    return %c0_i32, %c0_i32_0 : i32, i32
  }
  func.func @transform_2(%arg0: i32) -> (i32, i32) {
    %c0_i32 = arith.constant 0 : i32
    %c0_i32_0 = arith.constant 0 : i32
    %c0_i32_1 = arith.constant 0 : i32
    return %c0_i32, %c0_i32_0 : i32, i32
  }
  func.func @transform_3(%arg0: i32) -> (i32, i32) {
    %c0_i32 = arith.constant 0 : i32
    %c0_i32_0 = arith.constant 0 : i32
    %c0_i32_1 = arith.constant 0 : i32
    return %c0_i32, %c0_i32_0 : i32, i32
  }
  func.func @transform_4(%arg0: i32) -> (i32, i32) {
    %c0_i32 = arith.constant 0 : i32
    %c0_i32_0 = arith.constant 0 : i32
    %c0_i32_1 = arith.constant 0 : i32
    return %c0_i32, %c0_i32_0 : i32, i32
  }
  func.func @transform_5(%arg0: i32) -> (i32, i32) {
    %c0_i32 = arith.constant 0 : i32
    %c0_i32_0 = arith.constant 0 : i32
    %c0_i32_1 = arith.constant 0 : i32
    return %c0_i32, %c0_i32_0 : i32, i32
  }
  func.func @transform_6(%arg0: i32) -> (i32, i32) {
    %c0_i32 = arith.constant 0 : i32
    %c0_i32_0 = arith.constant 0 : i32
    %c0_i32_1 = arith.constant 0 : i32
    return %c0_i32, %c0_i32_0 : i32, i32
  }
  func.func @transform_7(%arg0: i32) -> (i32, i32) {
    %c0_i32 = arith.constant 0 : i32
    %c0_i32_0 = arith.constant 0 : i32
    return %arg0, %c0_i32 : i32, i32
  }
}

</mosaic_0001>

<bundles_post_ra>
// kernel: tpu_custom_call.1
= control target key start
LH: loop header
LB: loop body
LE: loop exit
PB: predicated region body
PF: predicated region fallthrough
CT: control target
= control target key end

     0   :  { %12 = vsyncpa [#allocation3], 0  ;;  %s1208_s0 = inlined_call_operand.hbm [shape: f32[128,128], index: 0, kind: input, shape index: {}]   ;;  %s1209_s1 = inlined_call_operand.hbm [shape: bf16[128,128], index: 1, kind: input, shape index: {}]   ;;  %s1210_s2 = inlined_call_operand.vmem [shape: f32[1,128], index: 2, kind: input, shape index: {}]   ;;  %s1211_s3 = inlined_call_operand.hbm [shape: bf16[128,128], index: 3, kind: input, shape index: {}]   ;;  %s1212_s4 = inlined_call_operand.vmem [shape: f32[1,128], index: 4, kind: input, shape index: {}]   ;;  %s1213_s5 = inlined_call_operand.hbm [shape: bf16[128,128], index: 5, kind: input, shape index: {}]   ;;  %s1214_s6 = inlined_call_operand.vmem [shape: f32[1,128], index: 6, kind: input, shape index: {}]   ;;  %s1215_s7 = inlined_call_operand.hbm [shape: f32[128,128], index: 7, kind: output, shape index: {}]  }
   0x1   :  { %13 = vsyncpa [#allocation6], 0 }
   0x2   :  { %14 = vsyncpa [#allocation9], 0 }
   0x3   :  { %15 = vsyncpa [#allocation4], 0  ;;  %s1032_s24 = smov [#allocation5]   ;;  %s914_s28 = scalar_lea.hbm %s1209_s1, 1024 }
   0x4   :  { %s33_s25 = sshll.u32 %s1032_s24, 4  ;;  %p915_p0 = scmp.ne.s32.totalorder %s1209_s1, %s914_s28  ;;  %s34_s25 = int_to_ptr.vmem [resolvable:$true] %s33_s25 }
   0x5   :  { %p918_p1 = scmp.lt.u32.totalorder %s914_s28, %s1209_s1 }
   0x7   :  { %p920_p2 = pnand %p918_p1, %p915_p0 }
   0x9   :  { %923 = shalt.err (!%p920_p2)
}
   0xa   :  { %s924_s10 = scalar_lea.vmem %s34_s25, 1024  ;;  %p929_p4 = scmp.lt.s32.totalorder %s34_s25, %s34_s25 }
   0xb   :  { %p925_p3 = scmp.ne.s32.totalorder %s34_s25, %s924_s10  ;;  %p930_p5 = scmp.lt.s32.totalorder %s924_s10, %s924_s10 }
   0xd   :  { %p931_p6 = por %p930_p5, %p929_p4 }
   0xf   :  { %p932_p7 = pnand %p931_p6, %p925_p3 }
  0x11   :  { %935 = shalt.err (!%p932_p7)
}
  0x12   :  { %s1033_s11 = smov 64   ;;  %s1034_s12 = smov 4  }
  0x13   :  { %39 = dma.hbm_to_vmem [thread:$0]  %s1209_s1, 1024, %s34_s25, [#allocation6], %s1033_s11, %s1033_s11, %s1034_s12  }
  0x14   :  { %s1035_s15 = smov [#allocation2]   ;;  %s936_s19 = scalar_lea.hbm %s1208_s0, 2048 }
  0x15   :  { %s21_s16 = sshll.u32 %s1035_s15, 4  ;;  %p937_p8 = scmp.ne.s32.totalorder %s1208_s0, %s936_s19  ;;  %s22_s16 = int_to_ptr.vmem [resolvable:$true] %s21_s16 }
  0x16   :  { %p940_p9 = scmp.lt.u32.totalorder %s936_s19, %s1208_s0 }
  0x18   :  { %p942_p10 = pnand %p940_p9, %p937_p8 }
  0x1a   :  { %945 = shalt.err (!%p942_p10)
}
  0x1b   :  { %s946_s24 = scalar_lea.vmem %s22_s16, 2048  ;;  %p951_p12 = scmp.lt.s32.totalorder %s22_s16, %s22_s16 }
  0x1c   :  { %p947_p11 = scmp.ne.s32.totalorder %s22_s16, %s946_s24  ;;  %p952_p13 = scmp.lt.s32.totalorder %s946_s24, %s946_s24 }
  0x1e   :  { %p953_p0 = por %p952_p13, %p951_p12 }
  0x20   :  { %p954_p1 = pnand %p953_p0, %p947_p11 }
  0x22   :  { %957 = shalt.err (!%p954_p1)
}
  0x23   :  { %s1036_s1 = smov 128   ;;  %s1037_s25 = smov 8  }
  0x24   :  { %27 = dma.hbm_to_vmem [thread:$0]  %s1208_s0, 2048, %s22_s16, [#allocation3], %s1036_s1, %s1036_s1, %s1037_s25  }
  0x25   :  { %s1038_s28 = smov [#allocation7]   ;;  %s1039_s30 = smov [#allocation8]  }
  0x26   :  { %s47_s29 = sshll.u32 %s1038_s28, 4  ;;  %s61_s8 = sshll.u32 %s1039_s30, 4  ;;  %s48_s29 = int_to_ptr.vmem [resolvable:$true] %s47_s29  ;;  %s1111_s8 = int_to_ptr.vmem [resolvable:$true] %s61_s8 }
  0x27   :  { %s958_s13 = scalar_lea.hbm %s1211_s3, 1024 }
  0x28   :  { %p959_p2 = scmp.ne.s32.totalorder %s1211_s3, %s958_s13  ;;  %p962_p3 = scmp.lt.u32.totalorder %s958_s13, %s1211_s3 }
  0x2a   :  { %p964_p4 = pnand %p962_p3, %p959_p2 }
  0x2c   :  { %967 = shalt.err (!%p964_p4)
}
  0x2d   :  { %s968_s0 = scalar_lea.vmem %s48_s29, 1024  ;;  %p973_p6 = scmp.lt.s32.totalorder %s48_s29, %s48_s29 }
  0x2e   :  { %p969_p5 = scmp.ne.s32.totalorder %s48_s29, %s968_s0  ;;  %p974_p7 = scmp.lt.s32.totalorder %s968_s0, %s968_s0 }
  0x30   :  { %p975_p8 = por %p974_p7, %p973_p6 }
  0x32   :  { %p976_p9 = pnand %p975_p8, %p969_p5 }
  0x34   :  { %979 = shalt.err (!%p976_p9)
}
  0x35   :  { %53 = dma.hbm_to_vmem [thread:$0]  %s1211_s3, 1024, %s48_s29, [#allocation6], %s1033_s11, %s1033_s11, %s1034_s12  }
  0x36   :  { %s980_s22 = scalar_lea.hbm %s1213_s5, 1024 }
  0x37   :  { %p981_p10 = scmp.ne.s32.totalorder %s1213_s5, %s980_s22  ;;  %p984_p11 = scmp.lt.u32.totalorder %s980_s22, %s1213_s5 }
  0x39   :  { %p986_p12 = pnand %p984_p11, %p981_p10 }
  0x3b   :  { %989 = shalt.err (!%p986_p12)
}
  0x3c   :  { %s990_s28 = scalar_lea.vmem %s1111_s8, 1024  ;;  %p995_p0 = scmp.lt.s32.totalorder %s1111_s8, %s1111_s8 }
  0x3d   :  { %p991_p13 = scmp.ne.s32.totalorder %s1111_s8, %s990_s28  ;;  %p996_p1 = scmp.lt.s32.totalorder %s990_s28, %s990_s28 }
  0x3f   :  { %p997_p2 = por %p996_p1, %p995_p0 }
  0x41   :  { %p998_p3 = pnand %p997_p2, %p991_p13 }
  0x43   :  { %1001 = shalt.err (!%p998_p3)
}
  0x44   :  { %67 = dma.hbm_to_vmem [thread:$0]  %s1213_s5, 1024, %s1111_s8, [#allocation9], %s1033_s11, %s1033_s11, %s1034_s12  }
  0x45   :  { %1024 = dma.done.wait [#allocation3], 2048  }
  0x46   :  { %1025 = vsyncadd [#allocation3], 4294965248 }
  0x47   :  { %1026 = dma.done.wait [#allocation6], 2048  }
  0x48   :  { %1027 = vsyncadd [#allocation6], 4294965248 }
  0x49   :  { %1028 = dma.done.wait [#allocation9], 1024  }
  0x4a   :  { %1029 = vsyncadd [#allocation9], 4294966272  ;;  %v890_v0 = vld [vmem:[#allocation5] sm:$0xff]   ;;  %v891_v1 = vld [vmem:[#allocation5 + $0x8] sm:$0xff]  }
  0x4b   :  { %769 = vmatprep.subr.bf16.mxu0 %v890_v0  ;;  %v892_v2 = vld [vmem:[#allocation5 + $0x10] sm:$0xff]   ;;  %v893_v3 = vld [vmem:[#allocation5 + $0x18] sm:$0xff]   ;;  %v83_v4 = vld [vmem:[#allocation2] sm:$0xff] }
  0x4c   :  { %770 = vmatpush3.bf16.msra.mxu0 %v890_v0  ;;  %v84_v5 = vld [vmem:[#allocation2 + $0x8] sm:$0xff]  ;;  %v894_v7 = vld [vmem:[#allocation5 + $0x20] sm:$0xff]   ;;  %v900_v11 = vld [vmem:[#allocation7 + $0x10] sm:$0xff]  }
  0x4d   :  { %771 = vmatprep.subr.bf16.mxu0 %v891_v1  ;;  %v116_v6 = vpack.c.bf16 %v84_v5, %v83_v4  ;;  %v898_v8 = vld [vmem:[#allocation7] sm:$0xff]   ;;  %v899_v9 = vld [vmem:[#allocation7 + $0x8] sm:$0xff]   ;;  %v896_v12 = vld [vmem:[#allocation5 + $0x30] sm:$0xff]  }
  0x4e   :  { %v895_v10 = vld [vmem:[#allocation5 + $0x28] sm:$0xff]   ;;  %801 = vmatprep.subr.bf16.mxu1 %v898_v8  ;;  %v901_v13 = vld [vmem:[#allocation7 + $0x18] sm:$0xff]   ;;  %v902_v15 = vld [vmem:[#allocation7 + $0x20] sm:$0xff]  }
  0x4f   :  { %785 = vmatprep.mubr.bf16.mxu0 %v116_v6  ;;  %802 = vmatpush3.bf16.msra.mxu1 %v898_v8  ;;  %v897_v14 = vld [vmem:[#allocation5 + $0x38] sm:$0xff]   ;;  %v85_v16 = vld [vmem:[#allocation2 + $0x10] sm:$0xff]  ;;  %v87_v18 = vld [vmem:[#allocation2 + $0x20] sm:$0xff] }
  0x50   :  { %772 = vmatpush3.bf16.msra.mxu0 %v891_v1  ;;  %803 = vmatprep.subr.bf16.mxu1 %v899_v9  ;;  %v86_v17 = vld [vmem:[#allocation2 + $0x18] sm:$0xff]  ;;  %v88_v19 = vld [vmem:[#allocation2 + $0x28] sm:$0xff]  ;;  %v89_v23 = vld [vmem:[#allocation2 + $0x30] sm:$0xff] }
  0x51   :  { %773 = vmatprep.subr.bf16.mxu0 %v892_v2  ;;  %v117_v20 = vpack.c.bf16 %v86_v17, %v85_v16  ;;  %v903_v21 = vld [vmem:[#allocation7 + $0x28] sm:$0xff]   ;;  %v118_v22 = vpack.c.bf16 %v88_v19, %v87_v18  ;;  %v90_v24 = vld [vmem:[#allocation2 + $0x38] sm:$0xff]  ;;  %v91_v25 = vld [vmem:[#allocation2 + $0x40] sm:$0xff] }
  0x52   :  { %v92_v26 = vld [vmem:[#allocation2 + $0x48] sm:$0xff]  ;;  %v119_v27 = vpack.c.bf16 %v90_v24, %v89_v23  ;;  %v93_v29 = vld [vmem:[#allocation2 + $0x50] sm:$0xff]  ;;  %v94_v30 = vld [vmem:[#allocation2 + $0x58] sm:$0xff] }
  0x53   :  { %804 = vmatpush3.bf16.msra.mxu1 %v899_v9  ;;  %v120_v28 = vpack.c.bf16 %v92_v26, %v91_v25  ;;  %v95_v31 = vld [vmem:[#allocation2 + $0x60] sm:$0xff]  ;;  %v96_v32 = vld [vmem:[#allocation2 + $0x68] sm:$0xff]  ;;  %v121_v33 = vpack.c.bf16 %v94_v30, %v93_v29  ;;  %v97_v35 = vld [vmem:[#allocation2 + $0x70] sm:$0xff] }
  0x54   :  { %774 = vmatpush3.bf16.msra.mxu0 %v892_v2  ;;  %805 = vmatprep.subr.bf16.mxu1 %v900_v11  ;;  %v122_v34 = vpack.c.bf16 %v96_v32, %v95_v31  ;;  %v98_v36 = vld [vmem:[#allocation2 + $0x78] sm:$0xff]  ;;  %v904_v38 = vld [vmem:[#allocation7 + $0x30] sm:$0xff]   ;;  %v906_v40 = vld [vmem:[#allocation8] sm:$0xff]  }
  0x55   :  { %775 = vmatprep.subr.bf16.mxu0 %v893_v3  ;;  %v123_v37 = vpack.c.bf16 %v98_v36, %v97_v35  ;;  %v905_v39 = vld [vmem:[#allocation7 + $0x38] sm:$0xff]   ;;  %v907_v41 = vld [vmem:[#allocation8 + $0x8] sm:$0xff]   ;;  %v908_v42 = vld [vmem:[#allocation8 + $0x10] sm:$0xff]  }
  0x56   :  { %v1148_v43 = vld [vmem:[#allocation8 + $0x18] sm:$0xff]   ;;  %v1151_v44 = vld [vmem:[#allocation8 + $0x20] sm:$0xff]   ;;  %v1155_v45 = vld [vmem:[#allocation8 + $0x28] sm:$0xff]  }
  0x57   :  { %806 = vmatpush3.bf16.msra.mxu1 %v900_v11  ;;  %v1163_v46 = vld [vmem:[%s1210_s2] ss:$0 sm:$0xff] }
  0x58   :  { %776 = vmatpush3.bf16.msra.mxu0 %v893_v3  ;;  %807 = vmatprep.subr.bf16.mxu1 %v901_v13 }
  0x59   :  { %777 = vmatprep.subr.bf16.mxu0 %v894_v7 }
  0x5b   :  { %808 = vmatpush3.bf16.msra.mxu1 %v901_v13 }
  0x5c   :  { %778 = vmatpush3.bf16.msra.mxu0 %v894_v7  ;;  %809 = vmatprep.subr.bf16.mxu1 %v902_v15 }
  0x5d   :  { %779 = vmatprep.subr.bf16.mxu0 %v895_v10 }
  0x5f   :  { %810 = vmatpush3.bf16.msra.mxu1 %v902_v15 }
  0x60   :  { %780 = vmatpush3.bf16.msra.mxu0 %v895_v10  ;;  %811 = vmatprep.subr.bf16.mxu1 %v903_v21 }
  0x61   :  { %781 = vmatprep.subr.bf16.mxu0 %v896_v12 }
  0x63   :  { %812 = vmatpush3.bf16.msra.mxu1 %v903_v21 }
  0x64   :  { %782 = vmatpush3.bf16.msra.mxu0 %v896_v12  ;;  %813 = vmatprep.subr.bf16.mxu1 %v904_v38 }
  0x65   :  { %783 = vmatprep.subr.bf16.mxu0 %v897_v14 }
  0x67   :  { %814 = vmatpush3.bf16.msra.mxu1 %v904_v38 }
  0x68   :  { %784 = vmatpush3.bf16.msra.mxu0 %v897_v14  ;;  %815 = vmatprep.subr.bf16.mxu1 %v905_v39 }
  0x69   :  { %833 = vmatprep.subr.bf16.mxu0 %v906_v40 }
  0x6b   :  { %786 = vmatmul.mubr.bf16.vlgmr.msra.gmra.mrb[0].mxu0 %v117_v20  ;;  %816 = vmatpush3.bf16.msra.mxu1 %v905_v39  ;;  %v912_v39 = vld [vmem:[#allocation8 + $0x30] sm:$0xff]  }
  0x6c   :  { %789 = vmatprep.mubr.bf16.mxu0 %v118_v22  ;;  %865 = vmatprep.subr.bf16.mxu1 %v906_v40 }
  0x6d   :  { %834 = vmatpush3.bf16.msra.mxu0 %v906_v40 }
  0x6e   :  { %835 = vmatprep.subr.bf16.mxu0 %v907_v41 }
  0x71   :  { %836 = vmatpush3.bf16.msra.mxu0 %v907_v41 }
  0x72   :  { %837 = vmatprep.subr.bf16.mxu0 %v908_v42 }
  0x73   :  { %790 = vmatmul.mubr.bf16.gmra.mrb[4].mxu0 %v119_v27 }
  0x74   :  { %793 = vmatprep.mubr.bf16.mxu0 %v120_v28 }
  0x75   :  { %838 = vmatpush3.bf16.msra.mxu0 %v908_v42 }
  0x76   :  { %839 = vmatprep.subr.bf16.mxu0 %v1148_v43 }
  0x79   :  { %840 = vmatpush3.bf16.msra.mxu0 %v1148_v43 }
  0x7a   :  { %841 = vmatprep.subr.bf16.mxu0 %v1151_v44 }
  0x7b   :  { %794 = vmatmul.mubr.bf16.gmra.mrb[8].mxu0 %v121_v33 }
  0x7c   :  { %797 = vmatprep.mubr.bf16.mxu0 %v122_v34 }
  0x7d   :  { %842 = vmatpush3.bf16.msra.mxu0 %v1151_v44 }
  0x7e   :  { %843 = vmatprep.subr.bf16.mxu0 %v1155_v45 }
  0x81   :  { %844 = vmatpush3.bf16.msra.mxu0 %v1155_v45 }
  0x82   :  { %845 = vmatprep.subr.bf16.mxu0 %v912_v39 }
  0x83   :  { %798 = vmatmul.mubr.bf16.gmra.mrb[12].mxu0 %v123_v37 }
  0x85   :  { %846 = vmatpush3.bf16.msra.mxu0 %v912_v39 }
 0x13e   :  { %v787_v47 = vpop.f32.mrb[0].mxu0 }
 0x13f   :  { %v221_v48 = vadd.f32 %v787_v47, %v1163_v46  ;;  %v212_v49 = vpop.f32.mrb[1].mxu0 }
 0x140   :  { %v213_v50 = vadd.f32 %v1163_v46, %v212_v49  ;;  %v788_v51 = vpop.f32.mrb[2].mxu0 }
 0x141   :  { %v224_v52 = vadd.f32 %v788_v51, %v1163_v46  ;;  %v215_v53 = vpop.f32.mrb[3].mxu0  ;;  %v277_v55 = vmax.f32 %v221_v48, 0.0 }
 0x142   :  { %v216_v54 = vadd.f32 %v1163_v46, %v215_v53  ;;  %v275_v57 = vmax.f32 %v213_v50, 0.0 }
 0x143   :  { %v278_v56 = vmax.f32 %v224_v52, 0.0 }
 0x144   :  { %v276_v58 = vmax.f32 %v216_v54, 0.0 }
 0x145   :  { %v309_v59 = vpack.c.bf16 %v278_v56, %v277_v55 }
 0x146   :  { %v791_v60 = vpop.f32.mrb[4].mxu0  ;;  %v308_v61 = vpack.c.bf16 %v276_v58, %v275_v57 }
 0x147   :  { %v237_v62 = vadd.f32 %v791_v60, %v1163_v46  ;;  %v228_v63 = vpop.f32.mrb[5].mxu0 }
 0x148   :  { %v229_v0 = vadd.f32 %v1163_v46, %v228_v63  ;;  %v792_v1 = vpop.f32.mrb[6].mxu0  ;;  %817 = vmatprep.mubr.bf16.mxu1 %v308_v61 }
 0x149   :  { %v240_v2 = vadd.f32 %v792_v1, %v1163_v46  ;;  %v231_v3 = vpop.f32.mrb[7].mxu0  ;;  %818 = vmatmul.mubr.bf16.vlgmr.msra.gmra.mrb[0].mxu1 %v309_v59  ;;  %v281_v5 = vmax.f32 %v237_v62, 0.0 }
 0x14a   :  { %v232_v4 = vadd.f32 %v1163_v46, %v231_v3  ;;  %873 = vmatpush3.bf16.msra.mxu1 %v906_v40  ;;  %v279_v7 = vmax.f32 %v229_v0, 0.0  ;;  %v913_v40 = vld [vmem:[#allocation8 + $0x38] sm:$0xff]  }
 0x14b   :  { %v282_v6 = vmax.f32 %v240_v2, 0.0  ;;  %866 = vmatprep.subr.bf16.mxu1 %v907_v41  ;;  %847 = vmatprep.subr.bf16.mxu0 %v913_v40 }
 0x14c   :  { %v280_v8 = vmax.f32 %v232_v4, 0.0  ;;  %848 = vmatpush3.bf16.msra.mxu0 %v913_v40 }
 0x14d   :  { %v311_v9 = vpack.c.bf16 %v282_v6, %v281_v5 }
 0x14e   :  { %v310_v10 = vpack.c.bf16 %v280_v8, %v279_v7  ;;  %v795_v11 = vpop.f32.mrb[8].mxu0  ;;  %874 = vmatpush3.bf16.msra.mxu1 %v907_v41  ;;  %v703_v41 = vld [vmem:[%s1212_s4] ss:$0 sm:$0xff] }
 0x14f   :  { %v253_v12 = vadd.f32 %v795_v11, %v1163_v46  ;;  %v244_v13 = vpop.f32.mrb[9].mxu0  ;;  %867 = vmatprep.subr.bf16.mxu1 %v908_v42 }
 0x150   :  { %v245_v14 = vadd.f32 %v1163_v46, %v244_v13  ;;  %v796_v15 = vpop.f32.mrb[10].mxu0  ;;  %821 = vmatprep.mubr.bf16.mxu1 %v310_v10 }
 0x151   :  { %v256_v16 = vadd.f32 %v796_v15, %v1163_v46  ;;  %v247_v17 = vpop.f32.mrb[11].mxu0  ;;  %822 = vmatmul.mubr.bf16.gmra.mrb[4].mxu1 %v311_v9  ;;  %v285_v19 = vmax.f32 %v253_v12, 0.0 }
 0x152   :  { %v248_v18 = vadd.f32 %v1163_v46, %v247_v17  ;;  %875 = vmatpush3.bf16.msra.mxu1 %v908_v42  ;;  %v283_v21 = vmax.f32 %v245_v14, 0.0 }
 0x153   :  { %v286_v20 = vmax.f32 %v256_v16, 0.0  ;;  %868 = vmatprep.subr.bf16.mxu1 %v1148_v43 }
 0x154   :  { %v284_v22 = vmax.f32 %v248_v18, 0.0 }
 0x155   :  { %v313_v23 = vpack.c.bf16 %v286_v20, %v285_v19 }
 0x156   :  { %v312_v24 = vpack.c.bf16 %v284_v22, %v283_v21  ;;  %v799_v25 = vpop.f32.mrb[12].mxu0  ;;  %876 = vmatpush3.bf16.msra.mxu1 %v1148_v43 }
 0x157   :  { %v269_v26 = vadd.f32 %v799_v25, %v1163_v46  ;;  %v260_v27 = vpop.f32.mrb[13].mxu0  ;;  %869 = vmatprep.subr.bf16.mxu1 %v1151_v44 }
 0x158   :  { %v261_v28 = vadd.f32 %v1163_v46, %v260_v27  ;;  %v800_v29 = vpop.f32.mrb[14].mxu0  ;;  %825 = vmatprep.mubr.bf16.mxu1 %v312_v24 }
 0x159   :  { %v272_v30 = vadd.f32 %v800_v29, %v1163_v46  ;;  %v263_v31 = vpop.f32.mrb[15].mxu0  ;;  %826 = vmatmul.mubr.bf16.gmra.mrb[8].mxu1 %v313_v23  ;;  %v289_v33 = vmax.f32 %v269_v26, 0.0 }
 0x15a   :  { %v264_v32 = vadd.f32 %v1163_v46, %v263_v31  ;;  %877 = vmatpush3.bf16.msra.mxu1 %v1151_v44  ;;  %v287_v35 = vmax.f32 %v261_v28, 0.0 }
 0x15b   :  { %v290_v34 = vmax.f32 %v272_v30, 0.0  ;;  %870 = vmatprep.subr.bf16.mxu1 %v1155_v45 }
 0x15c   :  { %v288_v36 = vmax.f32 %v264_v32, 0.0 }
 0x15d   :  { %v315_v37 = vpack.c.bf16 %v290_v34, %v289_v33  ;;  %v712_v34 = vld [vmem:[%s1214_s6] ss:$0 sm:$0xff]  ;;  %s1040_s6 = smov [#allocation10]  }
 0x15e   :  { %v314_v38 = vpack.c.bf16 %v288_v36, %v287_v35  ;;  %878 = vmatpush3.bf16.msra.mxu1 %v1155_v45  ;;  %s680_s8 = sshll.u32 %s1040_s6, 4  ;;  %s681_s8 = int_to_ptr.vmem [resolvable:$true] %s680_s8 }
 0x15f   :  { %871 = vmatprep.subr.bf16.mxu1 %v912_v39  ;;  %s1002_s9 = scalar_lea.vmem %s681_s8, 2048  ;;  %p1007_p5 = scmp.lt.s32.totalorder %s681_s8, %s681_s8 }
 0x160   :  { %829 = vmatprep.mubr.bf16.mxu1 %v314_v38  ;;  %p1003_p4 = scmp.ne.s32.totalorder %s681_s8, %s1002_s9  ;;  %p1008_p6 = scmp.lt.s32.totalorder %s1002_s9, %s1002_s9 }
 0x161   :  { %830 = vmatmul.mubr.bf16.gmra.mrb[12].mxu1 %v315_v37 }
 0x162   :  { %879 = vmatpush3.bf16.msra.mxu1 %v912_v39  ;;  %p1009_p7 = por %p1008_p6, %p1007_p5 }
 0x163   :  { %872 = vmatprep.subr.bf16.mxu1 %v913_v40 }
 0x164   :  { %p1010_p8 = pnand %p1009_p7, %p1003_p4 }
 0x166   :  { %880 = vmatpush3.bf16.msra.mxu1 %v913_v40 }
 0x21c   :  { %v819_v42 = vpop.f32.mrb[0].mxu1 }
 0x21d   :  { %v413_v43 = vadd.f32 %v819_v42, %v703_v41  ;;  %v404_v44 = vpop.f32.mrb[1].mxu1 }
 0x21e   :  { %v405_v45 = vadd.f32 %v703_v41, %v404_v44  ;;  %v820_v46 = vpop.f32.mrb[2].mxu1 }
 0x21f   :  { %v416_v47 = vadd.f32 %v820_v46, %v703_v41  ;;  %v407_v48 = vpop.f32.mrb[3].mxu1  ;;  %v469_v50 = vmax.f32 %v413_v43, 0.0 }
 0x220   :  { %v408_v49 = vadd.f32 %v703_v41, %v407_v48  ;;  %v467_v52 = vmax.f32 %v405_v45, 0.0 }
 0x221   :  { %v470_v51 = vmax.f32 %v416_v47, 0.0 }
 0x222   :  { %v468_v53 = vmax.f32 %v408_v49, 0.0 }
 0x223   :  { %v501_v54 = vpack.c.bf16 %v470_v51, %v469_v50 }
 0x224   :  { %v500_v55 = vpack.c.bf16 %v468_v53, %v467_v52  ;;  %v823_v56 = vpop.f32.mrb[4].mxu1 }
 0x225   :  { %v429_v57 = vadd.f32 %v823_v56, %v703_v41  ;;  %v420_v58 = vpop.f32.mrb[5].mxu1 }
 0x226   :  { %v421_v59 = vadd.f32 %v703_v41, %v420_v58  ;;  %v824_v60 = vpop.f32.mrb[6].mxu1  ;;  %849 = vmatprep.mubr.bf16.mxu0 %v500_v55 }
 0x227   :  { %v432_v61 = vadd.f32 %v824_v60, %v703_v41  ;;  %v423_v62 = vpop.f32.mrb[7].mxu1  ;;  %850 = vmatmul.mubr.bf16.vlgmr.msra.gmra.mrb[16].mxu0 %v501_v54  ;;  %v473_v0 = vmax.f32 %v429_v57, 0.0 }
 0x228   :  { %v424_v63 = vadd.f32 %v703_v41, %v423_v62  ;;  %v471_v2 = vmax.f32 %v421_v59, 0.0 }
 0x229   :  { %v474_v1 = vmax.f32 %v432_v61, 0.0 }
 0x22a   :  { %v472_v3 = vmax.f32 %v424_v63, 0.0 }
 0x22b   :  { %v503_v4 = vpack.c.bf16 %v474_v1, %v473_v0 }
 0x22c   :  { %v502_v5 = vpack.c.bf16 %v472_v3, %v471_v2  ;;  %v827_v6 = vpop.f32.mrb[8].mxu1 }
 0x22d   :  { %v445_v7 = vadd.f32 %v827_v6, %v703_v41  ;;  %v436_v8 = vpop.f32.mrb[9].mxu1 }
 0x22e   :  { %v437_v9 = vadd.f32 %v703_v41, %v436_v8  ;;  %v828_v10 = vpop.f32.mrb[10].mxu1  ;;  %853 = vmatprep.mubr.bf16.mxu0 %v502_v5 }
 0x22f   :  { %v448_v11 = vadd.f32 %v828_v10, %v703_v41  ;;  %v439_v12 = vpop.f32.mrb[11].mxu1  ;;  %854 = vmatmul.mubr.bf16.gmra.mrb[20].mxu0 %v503_v4  ;;  %v477_v14 = vmax.f32 %v445_v7, 0.0 }
 0x230   :  { %v440_v13 = vadd.f32 %v703_v41, %v439_v12  ;;  %v475_v16 = vmax.f32 %v437_v9, 0.0 }
 0x231   :  { %v478_v15 = vmax.f32 %v448_v11, 0.0 }
 0x232   :  { %v476_v17 = vmax.f32 %v440_v13, 0.0 }
 0x233   :  { %v505_v18 = vpack.c.bf16 %v478_v15, %v477_v14 }
 0x234   :  { %v504_v19 = vpack.c.bf16 %v476_v17, %v475_v16  ;;  %v831_v20 = vpop.f32.mrb[12].mxu1 }
 0x235   :  { %v461_v21 = vadd.f32 %v831_v20, %v703_v41  ;;  %v452_v22 = vpop.f32.mrb[13].mxu1 }
 0x236   :  { %v453_v23 = vadd.f32 %v703_v41, %v452_v22  ;;  %v832_v24 = vpop.f32.mrb[14].mxu1  ;;  %857 = vmatprep.mubr.bf16.mxu1 %v504_v19 }
 0x237   :  { %v464_v25 = vadd.f32 %v832_v24, %v703_v41  ;;  %v455_v26 = vpop.f32.mrb[15].mxu1  ;;  %858 = vmatmul.mubr.bf16.vlgmr.msra.gmra.mrb[16].mxu1 %v505_v18  ;;  %v481_v28 = vmax.f32 %v461_v21, 0.0 }
 0x238   :  { %v456_v27 = vadd.f32 %v703_v41, %v455_v26  ;;  %v479_v30 = vmax.f32 %v453_v23, 0.0 }
 0x239   :  { %v482_v29 = vmax.f32 %v464_v25, 0.0 }
 0x23a   :  { %v480_v31 = vmax.f32 %v456_v27, 0.0 }
 0x23b   :  { %v507_v32 = vpack.c.bf16 %v482_v29, %v481_v28 }
 0x23c   :  { %v506_v33 = vpack.c.bf16 %v480_v31, %v479_v30 }
 0x23e   :  { %861 = vmatprep.mubr.bf16.mxu1 %v506_v33 }
 0x23f   :  { %862 = vmatmul.mubr.bf16.gmra.mrb[20].mxu1 %v507_v32 }
 0x2fa   :  { %v851_v35 = vpop.f32.mrb[16].mxu0 }
 0x2fb   :  { %v605_v36 = vadd.f32 %v851_v35, %v712_v34  ;;  %v596_v37 = vpop.f32.mrb[17].mxu0 }
 0x2fc   :  { %v597_v38 = vadd.f32 %v712_v34, %v596_v37  ;;  %v852_v39 = vpop.f32.mrb[18].mxu0 }
 0x2fd   :  { %661 = vst [vmem:[#allocation10 + $0x10] sm:$0xff] %v605_v36  ;;  %v608_v40 = vadd.f32 %v852_v39, %v712_v34  ;;  %v599_v41 = vpop.f32.mrb[19].mxu0 }
 0x2fe   :  { %659 = vst [vmem:[#allocation10] sm:$0xff] %v597_v38  ;;  %v600_v42 = vadd.f32 %v712_v34, %v599_v41 }
 0x2ff   :  { %662 = vst [vmem:[#allocation10 + $0x18] sm:$0xff] %v608_v40 }
 0x300   :  { %660 = vst [vmem:[#allocation10 + $0x8] sm:$0xff] %v600_v42 }
 0x302   :  { %v855_v43 = vpop.f32.mrb[20].mxu0 }
 0x303   :  { %v621_v44 = vadd.f32 %v855_v43, %v712_v34  ;;  %v612_v45 = vpop.f32.mrb[21].mxu0 }
 0x304   :  { %v613_v46 = vadd.f32 %v712_v34, %v612_v45  ;;  %v856_v47 = vpop.f32.mrb[22].mxu0 }
 0x305   :  { %665 = vst [vmem:[#allocation10 + $0x30] sm:$0xff] %v621_v44  ;;  %v624_v48 = vadd.f32 %v856_v47, %v712_v34  ;;  %v615_v49 = vpop.f32.mrb[23].mxu0 }
 0x306   :  { %663 = vst [vmem:[#allocation10 + $0x20] sm:$0xff] %v613_v46  ;;  %v616_v50 = vadd.f32 %v712_v34, %v615_v49 }
 0x307   :  { %666 = vst [vmem:[#allocation10 + $0x38] sm:$0xff] %v624_v48 }
 0x308   :  { %664 = vst [vmem:[#allocation10 + $0x28] sm:$0xff] %v616_v50 }
 0x30a   :  { %v859_v51 = vpop.f32.mrb[16].mxu1 }
 0x30b   :  { %v637_v52 = vadd.f32 %v859_v51, %v712_v34  ;;  %v628_v53 = vpop.f32.mrb[17].mxu1 }
 0x30c   :  { %v629_v54 = vadd.f32 %v712_v34, %v628_v53  ;;  %v860_v55 = vpop.f32.mrb[18].mxu1 }
 0x30d   :  { %669 = vst [vmem:[#allocation10 + $0x50] sm:$0xff] %v637_v52  ;;  %v640_v56 = vadd.f32 %v860_v55, %v712_v34  ;;  %v631_v57 = vpop.f32.mrb[19].mxu1 }
 0x30e   :  { %667 = vst [vmem:[#allocation10 + $0x40] sm:$0xff] %v629_v54  ;;  %v632_v58 = vadd.f32 %v712_v34, %v631_v57 }
 0x30f   :  { %670 = vst [vmem:[#allocation10 + $0x58] sm:$0xff] %v640_v56 }
 0x310   :  { %668 = vst [vmem:[#allocation10 + $0x48] sm:$0xff] %v632_v58 }
 0x312   :  { %v863_v59 = vpop.f32.mrb[20].mxu1 }
 0x313   :  { %v653_v60 = vadd.f32 %v863_v59, %v712_v34  ;;  %v644_v61 = vpop.f32.mrb[21].mxu1 }
 0x314   :  { %v645_v62 = vadd.f32 %v712_v34, %v644_v61  ;;  %v864_v63 = vpop.f32.mrb[22].mxu1 }
 0x315   :  { %673 = vst [vmem:[#allocation10 + $0x70] sm:$0xff] %v653_v60  ;;  %v656_v0 = vadd.f32 %v864_v63, %v712_v34  ;;  %v647_v1 = vpop.f32.mrb[23].mxu1 }
 0x316   :  { %671 = vst [vmem:[#allocation10 + $0x60] sm:$0xff] %v645_v62  ;;  %v648_v2 = vadd.f32 %v712_v34, %v647_v1 }
 0x317   :  { %674 = vst [vmem:[#allocation10 + $0x78] sm:$0xff] %v656_v0 }
 0x318   :  { %672 = vst [vmem:[#allocation10 + $0x68] sm:$0xff] %v648_v2 }
 0x319   :  { %1013 = shalt.err (!%p1010_p8)
}
 0x31a   :  { %s1014_s14 = scalar_lea.hbm %s1215_s7, 2048 }
 0x31b   :  { %p1015_p9 = scmp.ne.s32.totalorder %s1215_s7, %s1014_s14  ;;  %p1018_p10 = scmp.lt.u32.totalorder %s1014_s14, %s1215_s7 }
 0x31d   :  { %p1020_p11 = pnand %p1018_p10, %p1015_p9 }
 0x31f   :  { %1023 = shalt.err (!%p1020_p11)
}
 0x320   :  { %686 = dma.vmem_to_hbm [thread:$0]  %s681_s8, 2048, %s1215_s7, [#allocation4], %s1036_s1, %s1036_s1, %s1037_s25  }
 0x321   :  { %1030 = dma.done.wait [#allocation4], 2048  }
 0x322   :  { %1031 = vsyncadd [#allocation4], 4294965248 }
 0x323   :  { %690 = vsyncpa [#allocation3], 1 }
 0x324   :  { %691 = vsyncpa [#allocation6], 1 }
 0x325   :  { %692 = vsyncpa [#allocation9], 1 }
 0x326   :  { %693 = vsyncpa [#allocation4], 1 }

</bundles_post_ra>
